<compile_context>
chip_gen: v5e
topology: v5e:2x2
jax: 0.10.0
libtpu: 0.0.40
codegen_flags: <defaults>
</compile_context>

<pallas_src>
import jax
import jax.numpy as jnp
from jax.experimental import pallas as pl
from jax.experimental.pallas import tpu as pltpu

NEG_SLOPE = 0.2

# Lane-dense slab width: large multiple of 128 -> unmasked full-width stores.
_LANE = 512
# Per-block VMEM budget (bytes). With default double buffering the pipeline
# holds ~2x(in block) + 2x(out block); 4 * 4 MiB = 16 MiB stays well inside
# v7x's 32 MiB scoped-VMEM default (and trivially inside v5e/v6e's 128 MiB).
_BLOCK_BYTES = 4 * 1024 * 1024


def _leaky_relu_kernel(x_ref, o_ref):
    # Compute in f32 (v5e has no bf16 VALU); cast back on store.
    x = x_ref[...].astype(jnp.float32)
    y = jnp.where(x >= 0, x, jnp.float32(NEG_SLOPE) * x)
    o_ref[...] = y.astype(o_ref.dtype)


def _choose_row_tile(rows, lane, itemsize):
    """Largest row tile that fits the block budget, sublane-aligned."""
    # Minimum sublane multiple: 8 for 4-byte, 16 for 2-byte, 32 for 1-byte.
    sub_mult = 8 * (4 // itemsize)
    t = max(1, _BLOCK_BYTES // (lane * itemsize))
    t = min(t, rows)
    if t >= sub_mult:
        t = (t // sub_mult) * sub_mult
    else:
        # Tiny input: take the full row extent (block dim == array dim is
        # always a legal block shape).
        t = rows
    return t


def _leaky_relu_slab(flat):
    """Apply LeakyReLU(0.2) to a flat 1-D array via one lane-dense kernel."""
    total = flat.shape[0]
    padded = pl.cdiv(total, _LANE) * _LANE
    if padded != total:
        flat = jnp.pad(flat, (0, padded - total))
    rows = padded // _LANE
    x2d = flat.reshape(rows, _LANE)

    row_tile = _choose_row_tile(rows, _LANE, x2d.dtype.itemsize)
    grid = (pl.cdiv(rows, row_tile),)

    out = pl.pallas_call(
        _leaky_relu_kernel,
        out_shape=jax.ShapeDtypeStruct((rows, _LANE), x2d.dtype),
        grid=grid,
        in_specs=[pl.BlockSpec((row_tile, _LANE), lambda i: (i, 0))],
        out_specs=pl.BlockSpec((row_tile, _LANE), lambda i: (i, 0)),
        compiler_params=pltpu.CompilerParams(
            dimension_semantics=("parallel",)
        ),
    )(x2d)
    return out.reshape(-1)[:total]


@jax.jit
def _apply_fn_single(x):
    """fn applied to one (N, D) embedding tensor."""
    return _leaky_relu_slab(x.reshape(-1)).reshape(x.shape)


@jax.jit
def _apply_fn_both(node_emb, edge_emb):
    """fn applied to node and edge embeddings with a single kernel launch."""
    n_total = node_emb.size
    flat = jnp.concatenate(
        [node_emb.reshape(-1), edge_emb.reshape(-1)], axis=0
    )
    out = _leaky_relu_slab(flat)
    out_n = out[:n_total].reshape(node_emb.shape)
    out_e = out[n_total:].reshape(edge_emb.shape)
    return out_n, out_e


class GraphLambdaPallas:
    """JAX/Pallas equivalent of gatnnvs GraphLambda(fn=LeakyReLU(0.2)).

    The graph is a dict: {'ndata': {'emb': [N, D]}, 'edata': {'emb': [E, D]}}.
    Mirrors the PyTorch forward: mutate-and-return the graph container.
    """

    def __init__(self, node_key="emb", edge_key="emb"):
        self.node_key = node_key
        self.edge_key = edge_key

    def __call__(self, g):
        if self.node_key and self.edge_key:
            node = g["ndata"][self.node_key]
            edge = g["edata"][self.edge_key]
            if node.dtype == edge.dtype:
                # Fused single-launch path.
                out_n, out_e = _apply_fn_both(node, edge)
            else:
                out_n = _apply_fn_single(node)
                out_e = _apply_fn_single(edge)
            g["ndata"][self.node_key] = out_n
            g["edata"][self.edge_key] = out_e
        elif self.node_key:
            g["ndata"][self.node_key] = _apply_fn_single(
                g["ndata"][self.node_key]
            )
        elif self.edge_key:
            g["edata"][self.edge_key] = _apply_fn_single(
                g["edata"][self.edge_key]
            )
        return g


def _reference_leaky_relu(x):
    return jnp.where(x >= 0, x, NEG_SLOPE * x)


if __name__ == "__main__":
    key = jax.random.PRNGKey(0)
    k_n, k_e = jax.random.split(key)

    n_nodes, n_edges, emb_dim = 16, 32, 32
    node_emb = jax.random.normal(k_n, (n_nodes, emb_dim), dtype=jnp.float32)
    edge_emb = jax.random.normal(k_e, (n_edges, emb_dim), dtype=jnp.float32)

    g = {
        "ndata": {"emb": node_emb},
        "edata": {"emb": edge_emb},
    }

    module = GraphLambdaPallas(node_key="emb", edge_key="emb")
    g_out = module(g)

    out_nodes = jax.block_until_ready(g_out["ndata"]["emb"])
    out_edges = jax.block_until_ready(g_out["edata"]["emb"])

    # Correctness check against a pure-JAX reference.
    ref_nodes = _reference_leaky_relu(node_emb)
    ref_edges = _reference_leaky_relu(edge_emb)
    assert out_nodes.shape == (n_nodes, emb_dim)
    assert out_edges.shape == (n_edges, emb_dim)
    assert jnp.allclose(out_nodes, ref_nodes, atol=1e-6)
    assert jnp.allclose(out_edges, ref_edges, atol=1e-6)

    print("KERNEL_OK")
</pallas_src>

<mosaic_0001>
module attributes {stable_mosaic.version = 11 : i64} {
  func.func @_leaky_relu_kernel(%arg0: i32, %arg1: memref<3x512xf32, #tpu.memory_space<vmem>>, %arg2: memref<3x512xf32, #tpu.memory_space<vmem>>) attributes {dimension_semantics = [#tpu.dimension_semantics<parallel>], iteration_bounds = array<i64: 1>, scalar_prefetch = 0 : i64, scratch_operands = 0 : i64, tpu.core_type = #tpu.core_type<tc>, window_params = [{transform_indices = @transform_0, window_bounds = array<i64: 3, 512>}, {transform_indices = @transform_1, window_bounds = array<i64: 3, 512>}]} {
    %c0 = arith.constant 0 : index
    %c0_0 = arith.constant 0 : index
    %0 = vector.load %arg1[%c0, %c0_0] : memref<3x512xf32, #tpu.memory_space<vmem>>, vector<3x512xf32>
    %cst = arith.constant 0.000000e+00 : f32
    %1 = vector.broadcast %cst : f32 to vector<3x512xf32>
    %2 = arith.cmpf oge, %0, %1 : vector<3x512xf32>
    %cst_1 = arith.constant 2.000000e-01 : f32
    %3 = vector.broadcast %cst_1 : f32 to vector<3x512xf32>
    %4 = arith.mulf %3, %0 : vector<3x512xf32>
    %5 = arith.select %2, %0, %4 : vector<3x512xi1>, vector<3x512xf32>
    %c0_2 = arith.constant 0 : index
    %c0_3 = arith.constant 0 : index
    %6 = vector.load %arg2[%c0_2, %c0_3] : memref<3x512xf32, #tpu.memory_space<vmem>>, vector<3x512xf32>
    tpu.vector_store %arg2[%c0_2, %c0_3], %5 {strides = array<i32>} : memref<3x512xf32, #tpu.memory_space<vmem>>, vector<3x512xf32>,
    return
  }
  func.func @transform_0(%arg0: i32) -> (i32, i32) {
    %c0_i32 = arith.constant 0 : i32
    %c0_i32_0 = arith.constant 0 : i32
    return %arg0, %c0_i32 : i32, i32
  }
  func.func @transform_1(%arg0: i32) -> (i32, i32) {
    %c0_i32 = arith.constant 0 : i32
    %c0_i32_0 = arith.constant 0 : i32
    return %arg0, %c0_i32 : i32, i32
  }
}

</mosaic_0001>

<bundles_post_ra>
// kernel: _apply_fn_both.1
= control target key start
LH: loop header
LB: loop body
LE: loop exit
PB: predicated region body
PF: predicated region fallthrough
CT: control target
= control target key end

     0   :  { %s44_s0 = inlined_call_operand.vmem [shape: f32[3,512], index: 0, kind: input, shape index: {}]   ;;  %s45_s1 = inlined_call_operand.vmem [shape: f32[3,512], index: 1, kind: output, shape index: {}]  }
   0x1   :  { %v8_v0 = vld [vmem:[%s44_s0] sm:$0x77]  ;;  %v9_v1 = vld [vmem:[%s44_s0 + $0x8] sm:$0x77] }
   0x2   :  { %vm10_vm0 = vcmp.ge.f32.partialorder %v8_v0, 0.0  ;;  %v12_v2 = vmul.f32 0.2, %v8_v0  ;;  %vm11_vm1 = vcmp.ge.f32.partialorder %v9_v1, 0.0  ;;  %v13_v3 = vmul.f32 0.2, %v9_v1 }
   0x4   :  { %v14_v4 = vsel %vm10_vm0, %v8_v0, %v12_v2  ;;  %v15_v5 = vsel %vm11_vm1, %v9_v1, %v13_v3 }
   0x5   :  { %16 = vst [vmem:[%s45_s1] sm:$0x77] %v14_v4 }
   0x6   :  { %17 = vst [vmem:[%s45_s1 + $0x8] sm:$0x77] %v15_v5 }

</bundles_post_ra>
